<compile_context>
chip_gen: v7x
topology: tpu7x:2x2x1
jax: 0.10.0
libtpu: 0.0.40
codegen_flags: <defaults>
</compile_context>

<pallas_src>
import functools

import jax
import jax.numpy as jnp
from jax.experimental import pallas as pl
from jax.experimental.pallas import tpu as pltpu

_LANE = 128      # TPU vreg lane width (last dim)
_SUBLANE = 8     # TPU vreg sublane width (second-to-last dim)


def _mlp_actor_kernel(x_ref, w0_ref, b0_ref, w1_ref, b1_ref, w2_ref, b2_ref,
                      o_ref, *, act_limit):
    """Fused: act_limit * tanh( relu(relu(x@W0+b0) @ W1 + b1) @ W2 + b2 )."""
    x = x_ref[...]
    h = jnp.dot(x, w0_ref[...], preferred_element_type=jnp.float32) + b0_ref[...]
    h = jnp.maximum(h, 0.0)
    h = jnp.dot(h, w1_ref[...], preferred_element_type=jnp.float32) + b1_ref[...]
    h = jnp.maximum(h, 0.0)
    y = jnp.dot(h, w2_ref[...], preferred_element_type=jnp.float32) + b2_ref[...]
    o_ref[...] = (jnp.tanh(y) * act_limit).astype(o_ref.dtype)


def mlp_actor_forward(obs, params, act_limit, *, tile_b=1024):
    """obs: (B, obs_dim) -> (B, act_dim) = act_limit * tanh(MLP(obs)).

    params = [(W0, b0), (W1, b1), (W2, b2)] with W stored (in_features, out_features)
    (transpose of torch's nn.Linear layout; values equivalent, y = x @ W + b).
    """
    (w0, b0), (w1, b1), (w2, b2) = params
    B, obs_dim = obs.shape
    h0 = w0.shape[1]
    h1 = w1.shape[1]
    act_dim = w2.shape[1]

    # --- lane-dense output: zero-pad final out dim to a multiple of 128 -----
    act_pad = pl.cdiv(act_dim, _LANE) * _LANE
    if act_pad != act_dim:
        w2 = jnp.pad(w2, ((0, 0), (0, act_pad - act_dim)))
        b2 = jnp.pad(b2, (0, act_pad - act_dim))

    # biases as (1, n) rows so they broadcast over the batch tile in-kernel
    b0r = b0.reshape(1, h0)
    b1r = b1.reshape(1, h1)
    b2r = b2.reshape(1, act_pad)

    # --- batch tiling: tile must be a sublane multiple; pad B up to grid ----
    tb = min(tile_b, pl.cdiv(B, _SUBLANE) * _SUBLANE)
    b_pad = pl.cdiv(B, tb) * tb
    x = obs if b_pad == B else jnp.pad(obs, ((0, b_pad - B), (0, 0)))

    grid = (b_pad // tb,)
    kernel = functools.partial(_mlp_actor_kernel, act_limit=act_limit)

    out = pl.pallas_call(
        kernel,
        out_shape=jax.ShapeDtypeStruct((b_pad, act_pad), obs.dtype),
        grid=grid,
        in_specs=[
            pl.BlockSpec((tb, obs_dim), lambda i: (i, 0)),     # obs tile (streamed)
            pl.BlockSpec((obs_dim, h0), lambda i: (0, 0)),     # W0  (VMEM-resident)
            pl.BlockSpec((1, h0),       lambda i: (0, 0)),     # b0
            pl.BlockSpec((h0, h1),      lambda i: (0, 0)),     # W1
            pl.BlockSpec((1, h1),       lambda i: (0, 0)),     # b1
            pl.BlockSpec((h1, act_pad), lambda i: (0, 0)),     # W2 (lane-padded)
            pl.BlockSpec((1, act_pad),  lambda i: (0, 0)),     # b2 (lane-padded)
        ],
        out_specs=pl.BlockSpec((tb, act_pad), lambda i: (i, 0)),
        compiler_params=pltpu.CompilerParams(
            dimension_semantics=("parallel",)),                # megacore on v7x
    )(x, w0, b0r, w1, b1r, w2, b2r)

    return out[:B, :act_dim]


def init_mlp_actor_params(key, obs_dim, act_dim, hidden_sizes):
    """Deterministic synthetic init (uniform, torch-Linear-like fan_in scaling)."""
    sizes = [obs_dim] + list(hidden_sizes) + [act_dim]
    params = []
    for j in range(len(sizes) - 1):
        key, kw, kb = jax.random.split(key, 3)
        fan_in = sizes[j]
        bound = 1.0 / jnp.sqrt(jnp.float32(fan_in))
        w = jax.random.uniform(kw, (sizes[j], sizes[j + 1]), jnp.float32, -bound, bound)
        b = jax.random.uniform(kb, (sizes[j + 1],), jnp.float32, -bound, bound)
        params.append((w, b))
    return params


if __name__ == "__main__":
    obs_dim = 16
    act_dim = 4
    hidden_sizes = (32, 32)
    act_limit = 2.0
    batch = 2

    key = jax.random.PRNGKey(0)
    key, k_obs = jax.random.split(key)
    obs = jax.random.normal(k_obs, (batch, obs_dim), jnp.float32)

    params = init_mlp_actor_params(key, obs_dim, act_dim, hidden_sizes)

    out = mlp_actor_forward(obs, params, act_limit)
    out = jax.block_until_ready(out)

    # Pure-JAX reference of the same math.
    x_ref = obs
    for j, (w, b) in enumerate(params):
        x_ref = x_ref @ w + b
        x_ref = jnp.maximum(x_ref, 0.0) if j < len(params) - 1 else jnp.tanh(x_ref)
    ref = act_limit * x_ref

    assert out.shape == (batch, act_dim)
    assert jnp.allclose(out, ref, atol=1e-5, rtol=1e-5)
    assert jnp.all(jnp.abs(out) <= act_limit + 1e-5)

    print("KERNEL_OK")
</pallas_src>

<mosaic_0001>
module attributes {stable_mosaic.version = 11 : i64} {
  func.func @_mlp_actor_kernel(%arg0: i32, %arg1: memref<8x16xf32, #tpu.memory_space<vmem>>, %arg2: memref<16x32xf32, #tpu.memory_space<vmem>>, %arg3: memref<1x32xf32, #tpu.memory_space<vmem>>, %arg4: memref<32x32xf32, #tpu.memory_space<vmem>>, %arg5: memref<1x32xf32, #tpu.memory_space<vmem>>, %arg6: memref<32x128xf32, #tpu.memory_space<vmem>>, %arg7: memref<1x128xf32, #tpu.memory_space<vmem>>, %arg8: memref<8x128xf32, #tpu.memory_space<vmem>>) attributes {dimension_semantics = [#tpu.dimension_semantics<parallel>], iteration_bounds = array<i64: 1>, scalar_prefetch = 0 : i64, scratch_operands = 0 : i64, tpu.core_type = #tpu.core_type<tc>, window_params = [{transform_indices = @transform_0, window_bounds = array<i64: 8, 16>}, {pipeline_mode = #tpu.pipeline_mode<synchronous>, transform_indices = @transform_1, window_bounds = array<i64: 16, 32>}, {pipeline_mode = #tpu.pipeline_mode<synchronous>, transform_indices = @transform_2, window_bounds = array<i64: 1, 32>}, {pipeline_mode = #tpu.pipeline_mode<synchronous>, transform_indices = @transform_3, window_bounds = array<i64: 32, 32>}, {pipeline_mode = #tpu.pipeline_mode<synchronous>, transform_indices = @transform_4, window_bounds = array<i64: 1, 32>}, {pipeline_mode = #tpu.pipeline_mode<synchronous>, transform_indices = @transform_5, window_bounds = array<i64: 32, 128>}, {pipeline_mode = #tpu.pipeline_mode<synchronous>, transform_indices = @transform_6, window_bounds = array<i64: 1, 128>}, {transform_indices = @transform_7, window_bounds = array<i64: 8, 128>}]} {
    %c0 = arith.constant 0 : index
    %c0_0 = arith.constant 0 : index
    %0 = vector.load %arg1[%c0, %c0_0] : memref<8x16xf32, #tpu.memory_space<vmem>>, vector<8x16xf32>
    %c0_1 = arith.constant 0 : index
    %c0_2 = arith.constant 0 : index
    %1 = vector.load %arg2[%c0_1, %c0_2] : memref<16x32xf32, #tpu.memory_space<vmem>>, vector<16x32xf32>
    %cst = arith.constant dense<0.000000e+00> : vector<8x32xf32>
    %2 = tpu.matmul %0, %1, %cst {dimension_numbers = #tpu.dot_dimension_numbers<[1], [0], [0], [1], [0, 0, 1, 1], [], []>} : vector<8x16xf32>, vector<16x32xf32>, vector<8x32xf32> -> vector<8x32xf32>
    %c0_3 = arith.constant 0 : index
    %c0_4 = arith.constant 0 : index
    %3 = vector.load %arg3[%c0_3, %c0_4] : memref<1x32xf32, #tpu.memory_space<vmem>>, vector<1x32xf32>
    %4 = vector.broadcast %3 : vector<1x32xf32> to vector<8x32xf32>
    %5 = arith.addf %2, %4 : vector<8x32xf32>
    %cst_5 = arith.constant 0.000000e+00 : f32
    %6 = vector.broadcast %cst_5 : f32 to vector<8x32xf32>
    %7 = arith.maximumf %5, %6 : vector<8x32xf32>
    %c0_6 = arith.constant 0 : index
    %c0_7 = arith.constant 0 : index
    %8 = vector.load %arg4[%c0_6, %c0_7] : memref<32x32xf32, #tpu.memory_space<vmem>>, vector<32x32xf32>
    %cst_8 = arith.constant dense<0.000000e+00> : vector<8x32xf32>
    %9 = tpu.matmul %7, %8, %cst_8 {dimension_numbers = #tpu.dot_dimension_numbers<[1], [0], [0], [1], [0, 0, 1, 1], [], []>} : vector<8x32xf32>, vector<32x32xf32>, vector<8x32xf32> -> vector<8x32xf32>
    %c0_9 = arith.constant 0 : index
    %c0_10 = arith.constant 0 : index
    %10 = vector.load %arg5[%c0_9, %c0_10] : memref<1x32xf32, #tpu.memory_space<vmem>>, vector<1x32xf32>
    %11 = vector.broadcast %10 : vector<1x32xf32> to vector<8x32xf32>
    %12 = arith.addf %9, %11 : vector<8x32xf32>
    %cst_11 = arith.constant 0.000000e+00 : f32
    %13 = vector.broadcast %cst_11 : f32 to vector<8x32xf32>
    %14 = arith.maximumf %12, %13 : vector<8x32xf32>
    %c0_12 = arith.constant 0 : index
    %c0_13 = arith.constant 0 : index
    %15 = vector.load %arg6[%c0_12, %c0_13] : memref<32x128xf32, #tpu.memory_space<vmem>>, vector<32x128xf32>
    %cst_14 = arith.constant dense<0.000000e+00> : vector<8x128xf32>
    %16 = tpu.matmul %14, %15, %cst_14 {dimension_numbers = #tpu.dot_dimension_numbers<[1], [0], [0], [1], [0, 0, 1, 1], [], []>} : vector<8x32xf32>, vector<32x128xf32>, vector<8x128xf32> -> vector<8x128xf32>
    %c0_15 = arith.constant 0 : index
    %c0_16 = arith.constant 0 : index
    %17 = vector.load %arg7[%c0_15, %c0_16] : memref<1x128xf32, #tpu.memory_space<vmem>>, vector<1x128xf32>
    %18 = vector.broadcast %17 : vector<1x128xf32> to vector<8x128xf32>
    %19 = arith.addf %16, %18 : vector<8x128xf32>
    %20 = math.tanh %19 : vector<8x128xf32>
    %cst_17 = arith.constant 2.000000e+00 : f32
    %21 = vector.broadcast %cst_17 : f32 to vector<8x128xf32>
    %22 = arith.mulf %20, %21 : vector<8x128xf32>
    %c0_18 = arith.constant 0 : index
    %c0_19 = arith.constant 0 : index
    %23 = vector.load %arg8[%c0_18, %c0_19] : memref<8x128xf32, #tpu.memory_space<vmem>>, vector<8x128xf32>
    tpu.vector_store %arg8[%c0_18, %c0_19], %22 {strides = array<i32>} : memref<8x128xf32, #tpu.memory_space<vmem>>, vector<8x128xf32>,
    return
  }
  func.func @transform_0(%arg0: i32) -> (i32, i32) {
    %c0_i32 = arith.constant 0 : i32
    %c0_i32_0 = arith.constant 0 : i32
    return %arg0, %c0_i32 : i32, i32
  }
  func.func @transform_1(%arg0: i32) -> (i32, i32) {
    %c0_i32 = arith.constant 0 : i32
    %c0_i32_0 = arith.constant 0 : i32
    %c0_i32_1 = arith.constant 0 : i32
    return %c0_i32, %c0_i32_0 : i32, i32
  }
  func.func @transform_2(%arg0: i32) -> (i32, i32) {
    %c0_i32 = arith.constant 0 : i32
    %c0_i32_0 = arith.constant 0 : i32
    %c0_i32_1 = arith.constant 0 : i32
    return %c0_i32, %c0_i32_0 : i32, i32
  }
  func.func @transform_3(%arg0: i32) -> (i32, i32) {
    %c0_i32 = arith.constant 0 : i32
    %c0_i32_0 = arith.constant 0 : i32
    %c0_i32_1 = arith.constant 0 : i32
    return %c0_i32, %c0_i32_0 : i32, i32
  }
  func.func @transform_4(%arg0: i32) -> (i32, i32) {
    %c0_i32 = arith.constant 0 : i32
    %c0_i32_0 = arith.constant 0 : i32
    %c0_i32_1 = arith.constant 0 : i32
    return %c0_i32, %c0_i32_0 : i32, i32
  }
  func.func @transform_5(%arg0: i32) -> (i32, i32) {
    %c0_i32 = arith.constant 0 : i32
    %c0_i32_0 = arith.constant 0 : i32
    %c0_i32_1 = arith.constant 0 : i32
    return %c0_i32, %c0_i32_0 : i32, i32
  }
  func.func @transform_6(%arg0: i32) -> (i32, i32) {
    %c0_i32 = arith.constant 0 : i32
    %c0_i32_0 = arith.constant 0 : i32
    %c0_i32_1 = arith.constant 0 : i32
    return %c0_i32, %c0_i32_0 : i32, i32
  }
  func.func @transform_7(%arg0: i32) -> (i32, i32) {
    %c0_i32 = arith.constant 0 : i32
    %c0_i32_0 = arith.constant 0 : i32
    return %arg0, %c0_i32 : i32, i32
  }
}

</mosaic_0001>

<bundles_post_ra>
// kernel: tpu_custom_call.1
= control target key start
LH: loop header
LB: loop body
LE: loop exit
PB: predicated region body
PF: predicated region fallthrough
CT: control target
= control target key end

     0   :  { %12 = vsyncpa [#allocation3], 0  ;;  %s679_s0 = inlined_call_operand.hbm [shape: f32[8,16], index: 0, kind: input, shape index: {}]   ;;  %s680_s1 = inlined_call_operand.hbm [shape: f32[16,32], index: 1, kind: input, shape index: {}]   ;;  %s681_s2 = inlined_call_operand.vmem [shape: f32[1,32], index: 2, kind: input, shape index: {}]   ;;  %s682_s3 = inlined_call_operand.hbm [shape: f32[32,32], index: 3, kind: input, shape index: {}]   ;;  %s683_s4 = inlined_call_operand.vmem [shape: f32[1,32], index: 4, kind: input, shape index: {}]   ;;  %s684_s5 = inlined_call_operand.hbm [shape: f32[32,128], index: 5, kind: input, shape index: {}]   ;;  %s685_s6 = inlined_call_operand.vmem [shape: f32[1,128], index: 6, kind: input, shape index: {}]   ;;  %s686_s7 = inlined_call_operand.hbm [shape: f32[8,128], index: 7, kind: output, shape index: {}]  }
   0x1   :  { %13 = vsyncpa [#allocation6], 0 }
   0x2   :  { %14 = vsyncpa [#allocation9], 0 }
   0x3   :  { %15 = vsyncpa [#allocation4], 0  ;;  %s548_s24 = smov [#allocation5]   ;;  %s430_s28 = scalar_lea.hbm %s680_s1, 256 }
   0x4   :  { %s31_s25 = sshll.u32 %s548_s24, 4  ;;  %p431_p0 = scmp.ne.s32.totalorder %s680_s1, %s430_s28  ;;  %s32_s25 = int_to_ptr.vmem [resolvable:$true] %s31_s25 }
   0x5   :  { %p434_p1 = scmp.lt.u32.totalorder %s430_s28, %s680_s1 }
   0x7   :  { %p436_p2 = pnand %p434_p1, %p431_p0 }
   0x9   :  { %439 = shalt.err (!%p436_p2)
}
   0xa   :  { %s440_s10 = scalar_lea.vmem %s32_s25, 256  ;;  %p445_p4 = scmp.lt.s32.totalorder %s32_s25, %s32_s25 }
   0xb   :  { %p441_p3 = scmp.ne.s32.totalorder %s32_s25, %s440_s10  ;;  %p446_p5 = scmp.lt.s32.totalorder %s440_s10, %s440_s10 }
   0xd   :  { %p447_p6 = por %p446_p5, %p445_p4 }
   0xf   :  { %p448_p7 = pnand %p447_p6, %p441_p3 }
  0x11   :  { %451 = shalt.err (!%p448_p7)
}
  0x12   :  { %s549_s11 = smov 128   ;;  %s550_s12 = smov 8  }
  0x13   :  { %37 = dma.hbm_to_vmem [thread:$0]  %s680_s1, 256, %s32_s25, [#allocation6], %s549_s11, %s549_s11, %s550_s12  }
  0x14   :  { %s551_s15 = smov [#allocation2]   ;;  %s552_s17 = smov [#allocation7]  }
  0x15   :  { %s22_s16 = sshll.u32 %s551_s15, 4  ;;  %s45_s18 = sshll.u32 %s552_s17, 4  ;;  %s23_s16 = int_to_ptr.vmem [resolvable:$true] %s22_s16  ;;  %s46_s18 = int_to_ptr.vmem [resolvable:$true] %s45_s18 }
  0x16   :  { %s452_s21 = scalar_lea.hbm %s679_s0, 128 }
  0x17   :  { %p453_p8 = scmp.ne.s32.totalorder %s679_s0, %s452_s21  ;;  %p456_p9 = scmp.lt.u32.totalorder %s452_s21, %s679_s0 }
  0x19   :  { %p458_p10 = pnand %p456_p9, %p453_p8 }
  0x1b   :  { %461 = shalt.err (!%p458_p10)
}
  0x1c   :  { %s462_s1 = scalar_lea.vmem %s23_s16, 128  ;;  %p467_p12 = scmp.lt.s32.totalorder %s23_s16, %s23_s16 }
  0x1d   :  { %p463_p11 = scmp.ne.s32.totalorder %s23_s16, %s462_s1  ;;  %p468_p13 = scmp.lt.s32.totalorder %s462_s1, %s462_s1 }
  0x1f   :  { %p469_p0 = por %p468_p13, %p467_p12 }
  0x21   :  { %p470_p1 = pnand %p469_p0, %p463_p11 }
  0x23   :  { %473 = shalt.err (!%p470_p1)
}
  0x24   :  { %25 = dma.hbm_to_vmem [thread:$0]  %s679_s0, 128, %s23_s16, [#allocation3]  }
  0x25   :  { %s474_s30 = scalar_lea.hbm %s682_s3, 512 }
  0x26   :  { %p475_p2 = scmp.ne.s32.totalorder %s682_s3, %s474_s30  ;;  %p478_p3 = scmp.lt.u32.totalorder %s474_s30, %s682_s3 }
  0x28   :  { %p480_p4 = pnand %p478_p3, %p475_p2 }
  0x2a   :  { %483 = shalt.err (!%p480_p4)
}
  0x2b   :  { %s484_s14 = scalar_lea.vmem %s46_s18, 512  ;;  %p489_p6 = scmp.lt.s32.totalorder %s46_s18, %s46_s18 }
  0x2c   :  { %p485_p5 = scmp.ne.s32.totalorder %s46_s18, %s484_s14  ;;  %p490_p7 = scmp.lt.s32.totalorder %s484_s14, %s484_s14 }
  0x2e   :  { %p491_p8 = por %p490_p7, %p489_p6 }
  0x30   :  { %p492_p9 = pnand %p491_p8, %p485_p5 }
  0x32   :  { %495 = shalt.err (!%p492_p9)
}
  0x33   :  { %51 = dma.hbm_to_vmem [thread:$0]  %s682_s3, 512, %s46_s18, [#allocation6], %s549_s11, %s549_s11, %s550_s12  }
  0x34   :  { %s553_s16 = smov [#allocation8]   ;;  %s496_s21 = scalar_lea.hbm %s684_s5, 512 }
  0x35   :  { %s59_s17 = sshll.u32 %s553_s16, 4  ;;  %p497_p10 = scmp.ne.s32.totalorder %s684_s5, %s496_s21  ;;  %s60_s17 = int_to_ptr.vmem [resolvable:$true] %s59_s17 }
  0x36   :  { %p500_p11 = scmp.lt.u32.totalorder %s496_s21, %s684_s5 }
  0x38   :  { %p502_p12 = pnand %p500_p11, %p497_p10 }
  0x3a   :  { %505 = shalt.err (!%p502_p12)
}
  0x3b   :  { %s506_s1 = scalar_lea.vmem %s60_s17, 512  ;;  %p511_p0 = scmp.lt.s32.totalorder %s60_s17, %s60_s17 }
  0x3c   :  { %p507_p13 = scmp.ne.s32.totalorder %s60_s17, %s506_s1  ;;  %p512_p1 = scmp.lt.s32.totalorder %s506_s1, %s506_s1 }
  0x3e   :  { %p513_p2 = por %p512_p1, %p511_p0 }
  0x40   :  { %p514_p3 = pnand %p513_p2, %p507_p13 }
  0x42   :  { %517 = shalt.err (!%p514_p3)
}
  0x43   :  { %65 = dma.hbm_to_vmem [thread:$0]  %s684_s5, 512, %s60_s17, [#allocation9], %s549_s11, %s549_s11, %s550_s12  }
  0x44   :  { %540 = dma.done.wait [#allocation3], 128  }
  0x45   :  { %541 = vsyncadd [#allocation3], 4294967168 }
  0x46   :  { %542 = dma.done.wait [#allocation6], 768  }
  0x47   :  { %543 = vsyncadd [#allocation6], 4294966528 }
  0x48   :  { %544 = dma.done.wait [#allocation9], 512  }
  0x49   :  { %545 = vsyncadd [#allocation9], 4294966784  ;;  %v554_v0 = vmov 0.0|0.0   ;;  %vm555_vm0 = vmmov 0   ;;  %v556_v1 = vmov 0.0   ;;  %v81_v2 = vld [vmem:[#allocation5] sm:$0xff] }
  0x4a   :  { %403 = vmatprep.subr.bf16.mxu0 %v554_v0  ;;  %378 = vmatprep.mubr.msk.f32.mxu0 %vm555_vm0, %v556_v1  ;;  %v82_v3 = vld [vmem:[#allocation5 + $0x8] sm:$0xff]  ;;  %v165_v5 = vld [vmem:[#allocation7] sm:$0xff]  ;;  %v166_v6 = vld [vmem:[#allocation7 + $0x8] sm:$0xff]  ;;  %vm90_vm1 = vcmask 130048   ;;  %vm176_vm2 = vcmask 261120   ;;  %s557_s28 = smov [#allocation10]  }
  0x4b   :  { %406 = vmatprep.subr.bf16.mxu1 %v554_v0  ;;  %389 = vmatprep.mubr.msk.f32.mxu1 %vm555_vm0, %v556_v1  ;;  %v404_v4 = vpack.c.bf16 %v82_v3, %v81_v2  ;;  %v407_v7 = vpack.c.bf16 %v166_v6, %v165_v5  ;;  %v80_v8 = vld [vmem:[#allocation2] sm:$0xff]  ;;  %v167_v9 = vld [vmem:[#allocation7 + $0x10] sm:$0xff]  ;;  %v168_v10 = vld [vmem:[#allocation7 + $0x18] sm:$0xff]  ;;  %s344_s29 = sshll.u32 %s557_s28, 4  ;;  %s345_s29 = int_to_ptr.vmem [resolvable:$true] %s344_s29 }
  0x4c   :  { %v410_v11 = vpack.c.bf16 %v168_v10, %v167_v9  ;;  %v251_v12 = vld [vmem:[#allocation8] sm:$0xff]  ;;  %v252_v13 = vld [vmem:[#allocation8 + $0x8] sm:$0xff]  ;;  %v253_v20 = vld [vmem:[#allocation8 + $0x10] sm:$0xff]  ;;  %p523_p5 = scmp.lt.s32.totalorder %s345_s29, %s345_s29 }
  0x4d   :  { %405 = vmatpush3.bf16.msra.mxu0 %v404_v4  ;;  %408 = vmatpush3.bf16.msra.mxu1 %v407_v7  ;;  %v413_v14 = vpack.c.bf16 %v252_v13, %v251_v12  ;;  %v355_v15 = vld [vmem:[%s681_s2] ss:$0 sm:$0xff]  ;;  %v254_v21 = vld [vmem:[#allocation8 + $0x18] sm:$0xff] }
  0x4e   :  { %412 = vmatprep.subr.bf16.mxu0 %v554_v0  ;;  %409 = vmatprep.subr.bf16.mxu1 %v554_v0  ;;  %v416_v22 = vpack.c.bf16 %v254_v21, %v253_v20  ;;  %v357_v23 = vld [vmem:[%s683_s4] ss:$0 sm:$0xff]  ;;  %s518_s4 = scalar_lea.vmem %s345_s29, 128 }
  0x4f   :  { %v359_v28 = vld [vmem:[%s685_s6] ss:$0 sm:$0xff]  ;;  %p519_p4 = scmp.ne.s32.totalorder %s345_s29, %s518_s4  ;;  %p524_p6 = scmp.lt.s32.totalorder %s518_s4, %s518_s4 }
  0x50   :  { %379 = vmatmul.mubr.msk.f32.vlgmr.msra.gmra.mrb[0].mxu0 %vm90_vm1, %v80_v8 }
  0x51   :  { %400 = vmatprep.mubr.msk.f32.mxu0 %vm555_vm0, %v556_v1  ;;  %411 = vmatpush3.bf16.msra.mxu1 %v410_v11  ;;  %p525_p7 = por %p524_p6, %p523_p5 }
  0x52   :  { %414 = vmatpush3.bf16.msra.mxu0 %v413_v14 }
  0x53   :  { %415 = vmatprep.subr.bf16.mxu0 %v554_v0  ;;  %p526_p8 = pnand %p525_p7, %p519_p4 }
  0x56   :  { %417 = vmatpush3.bf16.msra.mxu0 %v416_v22 }
 0x123   :  { %v160_v16 = vpop.f32.mrb[0].mxu0 }
 0x124   :  { %v161_v17 = vadd.f32 %v355_v15, %v160_v16  ;;  %v380_v18 = vpop.f32.mrb[1].mxu0 }
 0x126   :  { %v164_v19 = vmax.f32 %v161_v17, 0.0 }
 0x128   :  { %390 = vmatmul.mubr.msk.f32.vlgmr.msra.gmra.mrb[0].mxu1 %vm176_vm2, %v164_v19 }
 0x1fb   :  { %v246_v24 = vpop.f32.mrb[0].mxu1 }
 0x1fc   :  { %v247_v25 = vadd.f32 %v357_v23, %v246_v24  ;;  %v391_v26 = vpop.f32.mrb[1].mxu1 }
 0x1fe   :  { %v250_v27 = vmax.f32 %v247_v25, 0.0 }
 0x200   :  { %401 = vmatmul.mubr.msk.f32.vlgmr.msra.gmra.mrb[2].mxu0 %vm176_vm2, %v250_v27 }
 0x2d3   :  { %v331_v29 = vpop.f32.mrb[2].mxu0 }
 0x2d4   :  { %v332_v30 = vadd.f32 %v359_v28, %v331_v29  ;;  %v402_v31 = vpop.f32.mrb[3].mxu0 }
 0x2d6   :  { %428 = vtanh.f32 %v332_v30 }
 0x2e0   :  { %v429_v32 = vpop.eup %428 }
 0x2e1   :  { %v336_v33 = vmul.f32 2.0, %v429_v32 }
 0x2e3   :  { %337 = vst [vmem:[#allocation10] sm:$0xff] %v336_v33 }
 0x2e4   :  { %529 = shalt.err (!%p526_p8)
}
 0x2e5   :  { %s530_s6 = scalar_lea.hbm %s686_s7, 128 }
 0x2e6   :  { %p531_p9 = scmp.ne.s32.totalorder %s686_s7, %s530_s6  ;;  %p534_p10 = scmp.lt.u32.totalorder %s530_s6, %s686_s7 }
 0x2e8   :  { %p536_p11 = pnand %p534_p10, %p531_p9 }
 0x2ea   :  { %539 = shalt.err (!%p536_p11)
}
 0x2eb   :  { %347 = dma.vmem_to_hbm [thread:$0]  %s345_s29, 128, %s686_s7, [#allocation4]  }
 0x2ec   :  { %546 = dma.done.wait [#allocation4], 128  }
 0x2ed   :  { %547 = vsyncadd [#allocation4], 4294967168 }
 0x2ee   :  { %351 = vsyncpa [#allocation3], 1 }
 0x2ef   :  { %352 = vsyncpa [#allocation6], 1 }
 0x2f0   :  { %353 = vsyncpa [#allocation9], 1 }
 0x2f1   :  { %354 = vsyncpa [#allocation4], 1 }

</bundles_post_ra>
